<compile_context>
chip_gen: v7x
topology: tpu7x:2x2x1
jax: 0.10.0
libtpu: 0.0.40
codegen_flags: <defaults>
</compile_context>

<pallas_src>
import functools

import jax
import jax.numpy as jnp
import numpy as np
from jax.experimental import pallas as pl
from jax.experimental.pallas import tpu as pltpu

NEG_INF = -1e30
LN_EPS = 1e-5            # torch.nn.LayerNorm default eps
PYG_SOFTMAX_EPS = 1e-16  # torch_geometric.utils.softmax denominator eps
NEG_SLOPE = 0.2          # HSLLayer default negative_slope

_VMEM = pl.BlockSpec(memory_space=pltpu.MemorySpace.VMEM)


# ----------------------------------------------------------------------------
# In-kernel building blocks
# ----------------------------------------------------------------------------
def _layernorm(x, g, b):
    mu = jnp.mean(x, axis=-1, keepdims=True)
    var = jnp.mean((x - mu) ** 2, axis=-1, keepdims=True)
    return (x - mu) * jax.lax.rsqrt(var + LN_EPS) * g + b


def _mlp(h, wbs):
    # rFF: Linear -> ReLU -> ... -> Linear (Normalization='None', dropout identity).
    n = len(wbs)
    for i, (w, b) in enumerate(wbs):
        h = jnp.dot(h, w, preferred_element_type=jnp.float32) + b
        if i < n - 1:
            h = jnp.maximum(h, 0.0)
    return h


def _hsl_layer_kernel(x_ref, src_ref, dst_ref, wkv_ref, bkv_ref, att_r_ref,
                      g0_ref, be0_ref, g1_ref, be1_ref, *rest,
                      num_dst, num_mlp_layers):
    """One HSLLayer forward (heads=1) on VMEM-resident values.

    x_ref   : [N, F]  node features
    src_ref : [E, 1]  int32 gather indices  (edge -> source node,      edge_index[0])
    dst_ref : [1, E]  int32 scatter indices (edge -> destination group, edge_index[1])
    """
    o_ref = rest[-1]
    mlp_flat = [r[...] for r in rest[:-1]]
    wbs = [(mlp_flat[2 * i], mlp_flat[2 * i + 1]) for i in range(num_mlp_layers)]

    x = x_ref[...]
    src_col = src_ref[...]
    dst_row = dst_ref[...]
    wkv, bkv, att_r = wkv_ref[...], bkv_ref[...], att_r_ref[...]
    g0, be0, g1, be1 = g0_ref[...], be0_ref[...], g1_ref[...], be1_ref[...]

    num_src, num_edges = x.shape[0], src_col.shape[0]
    d = att_r.shape[1]

    # Fused projection: [ lin_V(x) | alpha_r(x) ]  ->  [N, D+1]
    proj = jnp.dot(x, wkv, preferred_element_type=jnp.float32) + bkv

    # Gather projected rows at src indices: one-hot built in-register, bf16 MXU matmul.
    src_oh = (jax.lax.broadcasted_iota(jnp.int32, (num_edges, num_src), 1)
              == src_col).astype(jnp.bfloat16)                        # [E, N]
    gath = jnp.dot(src_oh, proj.astype(jnp.bfloat16),
                   preferred_element_type=jnp.float32)                # [E, D+1]
    x_gather = gath[:, :d]                                            # x_V[src]
    a_e = gath[:, d:d + 1]                                            # alpha_r[src]
    a_e = jnp.where(a_e >= 0.0, a_e, NEG_SLOPE * a_e)                 # leaky_relu
    a_row = jnp.transpose(a_e)                                        # [1, E]

    # Segment softmax over destination groups (torch_geometric.utils.softmax).
    dst_mask = (jax.lax.broadcasted_iota(jnp.int32, (num_dst, num_edges), 0)
                == dst_row)                                           # [M, E] bool
    seg_max = jnp.max(jnp.where(dst_mask, a_row, NEG_INF),
                      axis=-1, keepdims=True)                         # [M, 1]
    gmax_row = jnp.max(jnp.where(dst_mask, seg_max, NEG_INF),
                       axis=0, keepdims=True)                         # [1, E] = seg_max[dst]
    exp_row = jnp.exp(a_row - gmax_row)                               # [1, E]

    # Exp-weighted scatter matrix: W[m, e] = exp(a_e - seg_max[m]) iff dst[e] == m.
    w_scat = jnp.where(dst_mask, exp_row, 0.0)                        # [M, E]
    seg_sum = jnp.sum(w_scat, axis=-1, keepdims=True)                 # softmax denominator
    num = jnp.dot(w_scat.astype(jnp.bfloat16), x_gather.astype(jnp.bfloat16),
                  preferred_element_type=jnp.float32)                 # [M, D]
    out = num * pl.reciprocal(seg_sum + PYG_SOFTMAX_EPS, approx=True) + att_r

    out = _layernorm(out, g0, be0)                                    # ln0
    ff = _mlp(out, wbs)                                               # rFF
    o_ref[...] = _layernorm(out + jnp.maximum(ff, 0.0), g1, be1)      # ln1


# ----------------------------------------------------------------------------
# Wrapper (plain-JAX glue: weight fusion, index layout, pallas_call setup)
# ----------------------------------------------------------------------------
def _fuse_score_column(p):
    # alpha_r = (x @ wK + bK) . att_r  ==  x @ (wK @ att_r^T) + sum(bK * att_r)
    wka = jnp.dot(p["wK"], p["att_r"].T)                      # [F, 1]
    bka = jnp.sum(p["bK"] * p["att_r"]).reshape(1, 1)         # [1, 1]
    wkv = jnp.concatenate([p["wV"], wka], axis=1)             # [F, D+1]
    bkv = jnp.concatenate([p["bV"], bka], axis=1)             # [1, D+1]
    return wkv, bkv


def hsl_layer_forward(x, edge_index, params, num_dst=None):
    """HSLLayer.forward(x, edge_index) -> [num_dst, hid_dim] (eval mode, heads=1)."""
    src = edge_index[0].astype(jnp.int32)
    dst = edge_index[1].astype(jnp.int32)
    if num_dst is None:
        num_dst = int(jax.device_get(dst.max())) + 1          # edge_index[1].max() + 1
    e = int(src.shape[0])
    n, f_in = x.shape
    d = params["att_r"].shape[1]

    wkv, bkv = _fuse_score_column(params)
    mlp_flat = []
    for w, b in params["mlp"]:
        mlp_flat += [w, b]

    args = (x, src.reshape(e, 1), dst.reshape(1, e), wkv, bkv, params["att_r"],
            params["g0"], params["be0"], params["g1"], params["be1"], *mlp_flat)

    mlp_flops = sum(2 * num_dst * w.shape[0] * w.shape[1] for w, _ in params["mlp"])
    flops = (2 * n * f_in * (d + 1)        # fused projection
             + 2 * e * n * (d + 1)         # gather matmul
             + 2 * num_dst * e * d         # scatter matmul
             + mlp_flops)
    bytes_accessed = (sum(int(np.prod(a.shape)) * a.dtype.itemsize for a in args)
                      + num_dst * d * 4)

    kernel = functools.partial(_hsl_layer_kernel, num_dst=num_dst,
                               num_mlp_layers=len(params["mlp"]))
    return pl.pallas_call(
        kernel,
        out_shape=jax.ShapeDtypeStruct((num_dst, d), jnp.float32),
        in_specs=[_VMEM] * len(args),
        out_specs=_VMEM,
        compiler_params=pltpu.CompilerParams(vmem_limit_bytes=32 * 1024 * 1024),
        cost_estimate=pl.CostEstimate(flops=int(flops),
                                      transcendentals=int(e + 2 * num_dst),
                                      bytes_accessed=int(bytes_accessed)),
    )(*args)


# ----------------------------------------------------------------------------
# Pure-JAX reference (same math, exact segment ops) for correctness check
# ----------------------------------------------------------------------------
def _layernorm_ref(x, g, b):
    mu = jnp.mean(x, axis=-1, keepdims=True)
    var = jnp.mean((x - mu) ** 2, axis=-1, keepdims=True)
    return (x - mu) / jnp.sqrt(var + LN_EPS) * g + b


def hsl_layer_ref(x, edge_index, p, num_dst):
    src, dst = edge_index[0], edge_index[1]
    x_k = x @ p["wK"] + p["bK"]
    x_v = x @ p["wV"] + p["bV"]
    alpha_r = jnp.sum(x_k * p["att_r"], axis=-1)
    a = alpha_r[src]
    a = jnp.where(a >= 0.0, a, NEG_SLOPE * a)
    seg_max = jax.ops.segment_max(a, dst, num_segments=num_dst)
    exp_a = jnp.exp(a - seg_max[dst])
    seg_sum = jax.ops.segment_sum(exp_a, dst, num_segments=num_dst)
    alpha = exp_a / (seg_sum[dst] + PYG_SOFTMAX_EPS)
    msg = x_v[src] * alpha[:, None]
    out = jax.ops.segment_sum(msg, dst, num_segments=num_dst) + p["att_r"]
    out = _layernorm_ref(out, p["g0"], p["be0"])
    h = out
    for i, (w, b) in enumerate(p["mlp"]):
        h = h @ w + b
        if i < len(p["mlp"]) - 1:
            h = jnp.maximum(h, 0.0)
    return _layernorm_ref(out + jnp.maximum(h, 0.0), p["g1"], p["be1"])


# ----------------------------------------------------------------------------
# Deterministic parameter init (glorot, weights stored [in, out])
# ----------------------------------------------------------------------------
def _glorot(key, shape):
    stdv = float(np.sqrt(6.0 / (shape[-2] + shape[-1])))
    return jax.random.uniform(key, shape, jnp.float32, -stdv, stdv)


def init_hsl_layer(key, in_ch, d, num_mlp_layers=2):
    ks = jax.random.split(key, 6 + 2 * num_mlp_layers)
    mlp = []
    for i in range(num_mlp_layers):
        w = _glorot(ks[6 + 2 * i], (d, d))
        b = jax.random.uniform(ks[7 + 2 * i], (1, d), jnp.float32, -0.05, 0.05)
        mlp.append((w, b))
    return dict(
        wK=_glorot(ks[0], (in_ch, d)),
        bK=jax.random.uniform(ks[1], (1, d), jnp.float32, -0.1, 0.1),
        wV=_glorot(ks[2], (in_ch, d)),
        bV=jax.random.uniform(ks[3], (1, d), jnp.float32, -0.1, 0.1),
        att_r=_glorot(ks[4], (1, d)),
        mlp=mlp,
        g0=jnp.ones((1, d), jnp.float32), be0=jnp.zeros((1, d), jnp.float32),
        g1=jnp.ones((1, d), jnp.float32), be1=jnp.zeros((1, d), jnp.float32),
    )


# ----------------------------------------------------------------------------
if __name__ == "__main__":
    N_NODES, F_IN, D = 8, 16, 32     # in_channels=16, hid_dim=out_channels=32, heads=1

    # Hypergraph incidence edge_index = [node_idx; hyperedge_idx], plus self-loop
    # hyperedges (one per node), as in the HSL data convention.
    he_nodes = [[0, 1, 2], [2, 3, 4], [4, 5, 6], [6, 7, 0]]
    src_list, dst_list = [], []
    for he, nodes in enumerate(he_nodes):
        for nd in nodes:
            src_list.append(nd)
            dst_list.append(he)
    for nd in range(N_NODES):
        src_list.append(nd)
        dst_list.append(len(he_nodes) + nd)
    edge_index = jnp.array([src_list, dst_list], dtype=jnp.int32)   # [2, 20]
    NUM_DST = len(he_nodes) + N_NODES                               # 12 destination groups

    key = jax.random.PRNGKey(0)
    kx, kp = jax.random.split(key)
    x = jax.random.normal(kx, (N_NODES, F_IN), jnp.float32)
    params = init_hsl_layer(kp, F_IN, D, num_mlp_layers=2)

    out = hsl_layer_forward(x, edge_index, params, num_dst=NUM_DST)
    out = jax.block_until_ready(out)

    ref = hsl_layer_ref(x, edge_index, params, NUM_DST)
    ref = jax.block_until_ready(ref)

    assert out.shape == (NUM_DST, D)
    assert np.allclose(np.asarray(out), np.asarray(ref), atol=5e-2, rtol=5e-2)
    print("KERNEL_OK")
</pallas_src>

<mosaic_0001>
module attributes {stable_mosaic.version = 11 : i64} {
  func.func @_hsl_layer_kernel(%arg0: memref<8x16xf32, #tpu.memory_space<vmem>>, %arg1: memref<20x1xi32, #tpu.memory_space<vmem>>, %arg2: memref<1x20xi32, #tpu.memory_space<vmem>>, %arg3: memref<16x33xf32, #tpu.memory_space<vmem>>, %arg4: memref<1x33xf32, #tpu.memory_space<vmem>>, %arg5: memref<1x32xf32, #tpu.memory_space<vmem>>, %arg6: memref<1x32xf32, #tpu.memory_space<vmem>>, %arg7: memref<1x32xf32, #tpu.memory_space<vmem>>, %arg8: memref<1x32xf32, #tpu.memory_space<vmem>>, %arg9: memref<1x32xf32, #tpu.memory_space<vmem>>, %arg10: memref<32x32xf32, #tpu.memory_space<vmem>>, %arg11: memref<1x32xf32, #tpu.memory_space<vmem>>, %arg12: memref<32x32xf32, #tpu.memory_space<vmem>>, %arg13: memref<1x32xf32, #tpu.memory_space<vmem>>, %arg14: memref<12x32xf32, #tpu.memory_space<vmem>>) attributes {dimension_semantics = [], scalar_prefetch = 0 : i64, scratch_operands = 0 : i64, tpu.core_type = #tpu.core_type<tc>} {
    %c0 = arith.constant 0 : index
    %c0_0 = arith.constant 0 : index
    %0 = vector.load %arg10[%c0, %c0_0] : memref<32x32xf32, #tpu.memory_space<vmem>>, vector<32x32xf32>
    %c0_1 = arith.constant 0 : index
    %c0_2 = arith.constant 0 : index
    %1 = vector.load %arg11[%c0_1, %c0_2] : memref<1x32xf32, #tpu.memory_space<vmem>>, vector<1x32xf32>
    %c0_3 = arith.constant 0 : index
    %c0_4 = arith.constant 0 : index
    %2 = vector.load %arg12[%c0_3, %c0_4] : memref<32x32xf32, #tpu.memory_space<vmem>>, vector<32x32xf32>
    %c0_5 = arith.constant 0 : index
    %c0_6 = arith.constant 0 : index
    %3 = vector.load %arg13[%c0_5, %c0_6] : memref<1x32xf32, #tpu.memory_space<vmem>>, vector<1x32xf32>
    %c0_7 = arith.constant 0 : index
    %c0_8 = arith.constant 0 : index
    %4 = vector.load %arg0[%c0_7, %c0_8] : memref<8x16xf32, #tpu.memory_space<vmem>>, vector<8x16xf32>
    %c0_9 = arith.constant 0 : index
    %c0_10 = arith.constant 0 : index
    %5 = vector.load %arg1[%c0_9, %c0_10] : memref<20x1xi32, #tpu.memory_space<vmem>>, vector<20x1xi32>
    %c0_11 = arith.constant 0 : index
    %c0_12 = arith.constant 0 : index
    %6 = vector.load %arg2[%c0_11, %c0_12] : memref<1x20xi32, #tpu.memory_space<vmem>>, vector<1x20xi32>
    %c0_13 = arith.constant 0 : index
    %c0_14 = arith.constant 0 : index
    %7 = vector.load %arg3[%c0_13, %c0_14] : memref<16x33xf32, #tpu.memory_space<vmem>>, vector<16x33xf32>
    %c0_15 = arith.constant 0 : index
    %c0_16 = arith.constant 0 : index
    %8 = vector.load %arg4[%c0_15, %c0_16] : memref<1x33xf32, #tpu.memory_space<vmem>>, vector<1x33xf32>
    %c0_17 = arith.constant 0 : index
    %c0_18 = arith.constant 0 : index
    %9 = vector.load %arg5[%c0_17, %c0_18] : memref<1x32xf32, #tpu.memory_space<vmem>>, vector<1x32xf32>
    %c0_19 = arith.constant 0 : index
    %c0_20 = arith.constant 0 : index
    %10 = vector.load %arg6[%c0_19, %c0_20] : memref<1x32xf32, #tpu.memory_space<vmem>>, vector<1x32xf32>
    %c0_21 = arith.constant 0 : index
    %c0_22 = arith.constant 0 : index
    %11 = vector.load %arg7[%c0_21, %c0_22] : memref<1x32xf32, #tpu.memory_space<vmem>>, vector<1x32xf32>
    %c0_23 = arith.constant 0 : index
    %c0_24 = arith.constant 0 : index
    %12 = vector.load %arg8[%c0_23, %c0_24] : memref<1x32xf32, #tpu.memory_space<vmem>>, vector<1x32xf32>
    %c0_25 = arith.constant 0 : index
    %c0_26 = arith.constant 0 : index
    %13 = vector.load %arg9[%c0_25, %c0_26] : memref<1x32xf32, #tpu.memory_space<vmem>>, vector<1x32xf32>
    %cst = arith.constant dense<0.000000e+00> : vector<8x33xf32>
    %14 = tpu.matmul %4, %7, %cst {dimension_numbers = #tpu.dot_dimension_numbers<[1], [0], [0], [1], [0, 0, 1, 1], [], []>} : vector<8x16xf32>, vector<16x33xf32>, vector<8x33xf32> -> vector<8x33xf32>
    %15 = vector.broadcast %8 : vector<1x33xf32> to vector<8x33xf32>
    %16 = arith.addf %14, %15 : vector<8x33xf32>
    %17 = tpu.iota {dimensions = array<i32: 1>} : vector<20x8xi32>
    %18 = vector.broadcast %5 : vector<20x1xi32> to vector<20x8xi32>
    %19 = arith.cmpi eq, %17, %18 : vector<20x8xi32>
    %20 = arith.extui %19 : vector<20x8xi1> to vector<20x8xi32>
    %21 = arith.sitofp %20 : vector<20x8xi32> to vector<20x8xf32>
    %22 = arith.truncf %21 : vector<20x8xf32> to vector<20x8xbf16>
    %23 = arith.truncf %16 : vector<8x33xf32> to vector<8x33xbf16>
    %cst_27 = arith.constant dense<0.000000e+00> : vector<20x33xf32>
    %24 = tpu.matmul %22, %23, %cst_27 {dimension_numbers = #tpu.dot_dimension_numbers<[1], [0], [0], [1], [0, 0, 1, 1], [], []>} : vector<20x8xbf16>, vector<8x33xbf16>, vector<20x33xf32> -> vector<20x33xf32>
    %25 = vector.extract_strided_slice %24 {offsets = [0, 0], sizes = [20, 32], strides = [1, 1]} : vector<20x33xf32> to vector<20x32xf32>
    %26 = vector.extract_strided_slice %24 {offsets = [0, 32], sizes = [20, 1], strides = [1, 1]} : vector<20x33xf32> to vector<20x1xf32>
    %cst_28 = arith.constant 0.000000e+00 : f32
    %27 = vector.broadcast %cst_28 : f32 to vector<20x1xf32>
    %28 = arith.cmpf oge, %26, %27 : vector<20x1xf32>
    %cst_29 = arith.constant 2.000000e-01 : f32
    %29 = vector.broadcast %cst_29 : f32 to vector<20x1xf32>
    %30 = arith.mulf %29, %26 : vector<20x1xf32>
    %31 = arith.select %28, %26, %30 : vector<20x1xi1>, vector<20x1xf32>
    %32 = tpu.transpose %31, [1, 0] : vector<20x1xf32> -> vector<1x20xf32>
    %33 = tpu.iota {dimensions = array<i32: 0>} : vector<12x20xi32>
    %34 = vector.broadcast %6 : vector<1x20xi32> to vector<12x20xi32>
    %35 = arith.cmpi eq, %33, %34 : vector<12x20xi32>
    %cst_30 = arith.constant -1.000000e+30 : f32
    %36 = vector.shape_cast %32 : vector<1x20xf32> to vector<1x20xf32>
    %37 = vector.broadcast %36 : vector<1x20xf32> to vector<12x20xf32>
    %38 = vector.broadcast %cst_30 : f32 to vector<12x20xf32>
    %39 = arith.select %35, %37, %38 : vector<12x20xi1>, vector<12x20xf32>
    %cst_31 = arith.constant dense<0xFF800000> : vector<12xf32>
    %40 = vector.multi_reduction <maximumf>, %39, %cst_31 [1] : vector<12x20xf32> to vector<12xf32>
    %41 = vector.shape_cast %40 : vector<12xf32> to vector<12x1xf32>
    %cst_32 = arith.constant -1.000000e+30 : f32
    %42 = vector.shape_cast %41 : vector<12x1xf32> to vector<12x1xf32>
    %43 = vector.broadcast %42 : vector<12x1xf32> to vector<12x20xf32>
    %44 = vector.broadcast %cst_32 : f32 to vector<12x20xf32>
    %45 = arith.select %35, %43, %44 : vector<12x20xi1>, vector<12x20xf32>
    %cst_33 = arith.constant dense<0xFF800000> : vector<20xf32>
    %46 = vector.multi_reduction <maximumf>, %45, %cst_33 [0] : vector<12x20xf32> to vector<20xf32>
    %47 = vector.shape_cast %46 : vector<20xf32> to vector<1x20xf32>
    %48 = arith.subf %32, %47 : vector<1x20xf32>
    %49 = math.exp %48 : vector<1x20xf32>
    %cst_34 = arith.constant 0.000000e+00 : f32
    %50 = vector.shape_cast %49 : vector<1x20xf32> to vector<1x20xf32>
    %51 = vector.broadcast %50 : vector<1x20xf32> to vector<12x20xf32>
    %52 = vector.broadcast %cst_34 : f32 to vector<12x20xf32>
    %53 = arith.select %35, %51, %52 : vector<12x20xi1>, vector<12x20xf32>
    %cst_35 = arith.constant dense<0.000000e+00> : vector<12xf32>
    %54 = vector.multi_reduction <add>, %53, %cst_35 [1] : vector<12x20xf32> to vector<12xf32>
    %55 = vector.shape_cast %54 : vector<12xf32> to vector<12x1xf32>
    %56 = arith.truncf %53 : vector<12x20xf32> to vector<12x20xbf16>
    %57 = arith.truncf %25 : vector<20x32xf32> to vector<20x32xbf16>
    %cst_36 = arith.constant dense<0.000000e+00> : vector<12x32xf32>
    %58 = tpu.matmul %56, %57, %cst_36 {dimension_numbers = #tpu.dot_dimension_numbers<[1], [0], [0], [1], [0, 0, 1, 1], [], []>} : vector<12x20xbf16>, vector<20x32xbf16>, vector<12x32xf32> -> vector<12x32xf32>
    %cst_37 = arith.constant 1.000000e-16 : f32
    %59 = vector.broadcast %cst_37 : f32 to vector<12x1xf32>
    %60 = arith.addf %55, %59 : vector<12x1xf32>
    %61 = tpu.reciprocal %60 {approx = true} : vector<12x1xf32> -> vector<12x1xf32>
    %62 = vector.broadcast %61 : vector<12x1xf32> to vector<12x32xf32>
    %63 = arith.mulf %58, %62 : vector<12x32xf32>
    %64 = vector.broadcast %9 : vector<1x32xf32> to vector<12x32xf32>
    %65 = arith.addf %63, %64 : vector<12x32xf32>
    %cst_38 = arith.constant dense<0.000000e+00> : vector<12xf32>
    %66 = vector.multi_reduction <add>, %65, %cst_38 [1] : vector<12x32xf32> to vector<12xf32>
    %67 = vector.shape_cast %66 : vector<12xf32> to vector<12x1xf32>
    %cst_39 = arith.constant 3.200000e+01 : f32
    %68 = vector.broadcast %cst_39 : f32 to vector<12x1xf32>
    %69 = arith.divf %67, %68 : vector<12x1xf32>
    %70 = vector.broadcast %69 : vector<12x1xf32> to vector<12x32xf32>
    %71 = arith.subf %65, %70 : vector<12x32xf32>
    %72 = arith.mulf %71, %71 : vector<12x32xf32>
    %cst_40 = arith.constant dense<0.000000e+00> : vector<12xf32>
    %73 = vector.multi_reduction <add>, %72, %cst_40 [1] : vector<12x32xf32> to vector<12xf32>
    %74 = vector.shape_cast %73 : vector<12xf32> to vector<12x1xf32>
    %cst_41 = arith.constant 3.200000e+01 : f32
    %75 = vector.broadcast %cst_41 : f32 to vector<12x1xf32>
    %76 = arith.divf %74, %75 : vector<12x1xf32>
    %77 = vector.broadcast %69 : vector<12x1xf32> to vector<12x32xf32>
    %78 = arith.subf %65, %77 : vector<12x32xf32>
    %cst_42 = arith.constant 9.99999974E-6 : f32
    %79 = vector.broadcast %cst_42 : f32 to vector<12x1xf32>
    %80 = arith.addf %76, %79 : vector<12x1xf32>
    %81 = math.rsqrt %80 : vector<12x1xf32>
    %82 = vector.broadcast %81 : vector<12x1xf32> to vector<12x32xf32>
    %83 = arith.mulf %78, %82 : vector<12x32xf32>
    %84 = vector.broadcast %10 : vector<1x32xf32> to vector<12x32xf32>
    %85 = arith.mulf %83, %84 : vector<12x32xf32>
    %86 = vector.broadcast %11 : vector<1x32xf32> to vector<12x32xf32>
    %87 = arith.addf %85, %86 : vector<12x32xf32>
    %cst_43 = arith.constant dense<0.000000e+00> : vector<12x32xf32>
    %88 = tpu.matmul %87, %0, %cst_43 {dimension_numbers = #tpu.dot_dimension_numbers<[1], [0], [0], [1], [0, 0, 1, 1], [], []>} : vector<12x32xf32>, vector<32x32xf32>, vector<12x32xf32> -> vector<12x32xf32>
    %89 = vector.broadcast %1 : vector<1x32xf32> to vector<12x32xf32>
    %90 = arith.addf %88, %89 : vector<12x32xf32>
    %cst_44 = arith.constant 0.000000e+00 : f32
    %91 = vector.broadcast %cst_44 : f32 to vector<12x32xf32>
    %92 = arith.maximumf %90, %91 : vector<12x32xf32>
    %cst_45 = arith.constant dense<0.000000e+00> : vector<12x32xf32>
    %93 = tpu.matmul %92, %2, %cst_45 {dimension_numbers = #tpu.dot_dimension_numbers<[1], [0], [0], [1], [0, 0, 1, 1], [], []>} : vector<12x32xf32>, vector<32x32xf32>, vector<12x32xf32> -> vector<12x32xf32>
    %94 = vector.broadcast %3 : vector<1x32xf32> to vector<12x32xf32>
    %95 = arith.addf %93, %94 : vector<12x32xf32>
    %cst_46 = arith.constant 0.000000e+00 : f32
    %96 = vector.broadcast %cst_46 : f32 to vector<12x32xf32>
    %97 = arith.maximumf %95, %96 : vector<12x32xf32>
    %98 = arith.addf %87, %97 : vector<12x32xf32>
    %cst_47 = arith.constant dense<0.000000e+00> : vector<12xf32>
    %99 = vector.multi_reduction <add>, %98, %cst_47 [1] : vector<12x32xf32> to vector<12xf32>
    %100 = vector.shape_cast %99 : vector<12xf32> to vector<12x1xf32>
    %cst_48 = arith.constant 3.200000e+01 : f32
    %101 = vector.broadcast %cst_48 : f32 to vector<12x1xf32>
    %102 = arith.divf %100, %101 : vector<12x1xf32>
    %103 = vector.broadcast %102 : vector<12x1xf32> to vector<12x32xf32>
    %104 = arith.subf %98, %103 : vector<12x32xf32>
    %105 = arith.mulf %104, %104 : vector<12x32xf32>
    %cst_49 = arith.constant dense<0.000000e+00> : vector<12xf32>
    %106 = vector.multi_reduction <add>, %105, %cst_49 [1] : vector<12x32xf32> to vector<12xf32>
    %107 = vector.shape_cast %106 : vector<12xf32> to vector<12x1xf32>
    %cst_50 = arith.constant 3.200000e+01 : f32
    %108 = vector.broadcast %cst_50 : f32 to vector<12x1xf32>
    %109 = arith.divf %107, %108 : vector<12x1xf32>
    %110 = vector.broadcast %102 : vector<12x1xf32> to vector<12x32xf32>
    %111 = arith.subf %98, %110 : vector<12x32xf32>
    %cst_51 = arith.constant 9.99999974E-6 : f32
    %112 = vector.broadcast %cst_51 : f32 to vector<12x1xf32>
    %113 = arith.addf %109, %112 : vector<12x1xf32>
    %114 = math.rsqrt %113 : vector<12x1xf32>
    %115 = vector.broadcast %114 : vector<12x1xf32> to vector<12x32xf32>
    %116 = arith.mulf %111, %115 : vector<12x32xf32>
    %117 = vector.broadcast %12 : vector<1x32xf32> to vector<12x32xf32>
    %118 = arith.mulf %116, %117 : vector<12x32xf32>
    %119 = vector.broadcast %13 : vector<1x32xf32> to vector<12x32xf32>
    %120 = arith.addf %118, %119 : vector<12x32xf32>
    %c0_52 = arith.constant 0 : index
    %c0_53 = arith.constant 0 : index
    %121 = vector.load %arg14[%c0_52, %c0_53] : memref<12x32xf32, #tpu.memory_space<vmem>>, vector<12x32xf32>
    tpu.vector_store %arg14[%c0_52, %c0_53], %120 {strides = array<i32>} : memref<12x32xf32, #tpu.memory_space<vmem>>, vector<12x32xf32>,
    return
  }
}

</mosaic_0001>

<bundles_post_ra>
// kernel: tpu_custom_call.1
= control target key start
LH: loop header
LB: loop body
LE: loop exit
PB: predicated region body
PF: predicated region fallthrough
CT: control target
= control target key end

     0   :  { %19 = vsyncpa [#allocation3], 0  ;;  %s1415_s0 = inlined_call_operand.hbm [shape: f32[8,16], index: 0, kind: input, shape index: {}]   ;;  %s1416_s1 = inlined_call_operand.vmem [shape: s32[20,1], index: 1, kind: input, shape index: {}]   ;;  %s1417_s2 = inlined_call_operand.vmem [shape: s32[1,20], index: 2, kind: input, shape index: {}]   ;;  %s1418_s3 = inlined_call_operand.hbm [shape: f32[16,33], index: 3, kind: input, shape index: {}]   ;;  %s1419_s4 = inlined_call_operand.vmem [shape: f32[1,33], index: 4, kind: input, shape index: {}]   ;;  %s1420_s5 = inlined_call_operand.hbm [shape: f32[1,32], index: 5, kind: input, shape index: {}]   ;;  %s1421_s6 = inlined_call_operand.hbm [shape: f32[1,32], index: 6, kind: input, shape index: {}]   ;;  %s1422_s7 = inlined_call_operand.hbm [shape: f32[1,32], index: 7, kind: input, shape index: {}]   ;;  %s1423_s8 = inlined_call_operand.hbm [shape: f32[1,32], index: 8, kind: input, shape index: {}]   ;;  %s1424_s9 = inlined_call_operand.hbm [shape: f32[1,32], index: 9, kind: input, shape index: {}]   ;;  %s1425_s10 = inlined_call_operand.vmem [shape: f32[32,32], index: 10, kind: input, shape index: {}]   ;;  %s1426_s11 = inlined_call_operand.hbm [shape: f32[1,32], index: 11, kind: input, shape index: {}]   ;;  %s1427_s12 = inlined_call_operand.vmem [shape: f32[32,32], index: 12, kind: input, shape index: {}]   ;;  %s1428_s13 = inlined_call_operand.vmem [shape: f32[1,32], index: 13, kind: input, shape index: {}]   ;;  %s1429_s14 = inlined_call_operand.hbm [shape: f32[12,32], index: 14, kind: output, shape index: {}]  }
   0x1   :  { %20 = vsyncpa [#allocation6], 0 }
   0x2   :  { %21 = vsyncpa [#allocation9], 0 }
   0x3   :  { %22 = vsyncpa [#allocation12], 0 }
   0x4   :  { %23 = vsyncpa [#allocation15], 0 }
   0x5   :  { %24 = vsyncpa [#allocation4], 0  ;;  %s1132_s29 = smov [#allocation5]   ;;  %s922_s17 = scalar_lea.hbm %s1418_s3, 256 }
   0x6   :  { %s44_s30 = sshll.u32 %s1132_s29, 4  ;;  %p923_p0 = scmp.ne.s32.totalorder %s1418_s3, %s922_s17  ;;  %s45_s30 = int_to_ptr.vmem [resolvable:$true] %s44_s30 }
   0x7   :  { %p926_p1 = scmp.lt.u32.totalorder %s922_s17, %s1418_s3 }
   0x9   :  { %p928_p2 = pnand %p926_p1, %p923_p0 }
   0xb   :  { %931 = shalt.err (!%p928_p2)
}
   0xc   :  { %s932_s22 = scalar_lea.vmem %s45_s30, 256  ;;  %p937_p4 = scmp.lt.s32.totalorder %s45_s30, %s45_s30 }
   0xd   :  { %p933_p3 = scmp.ne.s32.totalorder %s45_s30, %s932_s22  ;;  %p938_p5 = scmp.lt.s32.totalorder %s932_s22, %s932_s22 }
   0xf   :  { %p939_p6 = por %p938_p5, %p937_p4 }
  0x11   :  { %p940_p7 = pnand %p939_p6, %p933_p3 }
  0x13   :  { %943 = shalt.err (!%p940_p7)
}
  0x14   :  { %s1133_s23 = smov 128   ;;  %s1134_s24 = smov 8  }
  0x15   :  { %50 = dma.hbm_to_vmem [thread:$0]  %s1418_s3, 256, %s45_s30, [#allocation6], %s1133_s23, %s1133_s23, %s1134_s24  }
  0x16   :  { %s1135_s27 = smov [#allocation8]   ;;  %s1136_s29 = smov [#allocation11]  }
  0x17   :  { %s69_s28 = sshll.u32 %s1135_s27, 4  ;;  %s89_s15 = sshll.u32 %s1136_s29, 4  ;;  %s70_s28 = int_to_ptr.vmem [resolvable:$true] %s69_s28  ;;  %s90_s15 = int_to_ptr.vmem [resolvable:$true] %s89_s15 }
  0x18   :  { %s944_s18 = scalar_lea.hbm %s1421_s6, 16 }
  0x19   :  { %p945_p8 = scmp.ne.s32.totalorder %s1421_s6, %s944_s18  ;;  %p948_p9 = scmp.lt.u32.totalorder %s944_s18, %s1421_s6 }
  0x1b   :  { %p950_p10 = pnand %p948_p9, %p945_p8 }
  0x1d   :  { %953 = shalt.err (!%p950_p10)
}
  0x1e   :  { %s954_s3 = scalar_lea.vmem %s70_s28, 16  ;;  %s958_s30 = scalar_lea.vmem %s70_s28, 32 }
  0x1f   :  { %p955_p11 = scmp.ne.s32.totalorder %s70_s28, %s954_s3  ;;  %p959_p12 = scmp.lt.s32.totalorder %s70_s28, %s70_s28 }
  0x20   :  { %p960_p13 = scmp.lt.s32.totalorder %s958_s30, %s954_s3 }
  0x22   :  { %p961_p0 = por %p960_p13, %p959_p12 }
  0x24   :  { %p962_p1 = pnand %p961_p0, %p955_p11 }
  0x26   :  { %965 = shalt.err (!%p962_p1)
}
  0x27   :  { %72 = dma.hbm_to_vmem [thread:$0]  %s1421_s6, 16, %s70_s28, [#allocation9]  }
  0x28   :  { %s966_s16 = scalar_lea.hbm %s1423_s8, 16 }
  0x29   :  { %p967_p2 = scmp.ne.s32.totalorder %s1423_s8, %s966_s16  ;;  %p970_p3 = scmp.lt.u32.totalorder %s966_s16, %s1423_s8 }
  0x2b   :  { %p972_p4 = pnand %p970_p3, %p967_p2 }
  0x2d   :  { %975 = shalt.err (!%p972_p4)
}
  0x2e   :  { %s976_s21 = scalar_lea.vmem %s90_s15, 16  ;;  %s980_s22 = scalar_lea.vmem %s90_s15, 32 }
  0x2f   :  { %p977_p5 = scmp.ne.s32.totalorder %s90_s15, %s976_s21  ;;  %p981_p6 = scmp.lt.s32.totalorder %s90_s15, %s90_s15 }
  0x30   :  { %p982_p7 = scmp.lt.s32.totalorder %s980_s22, %s976_s21 }
  0x32   :  { %p983_p8 = por %p982_p7, %p981_p6 }
  0x34   :  { %p984_p9 = pnand %p983_p8, %p977_p5 }
  0x36   :  { %987 = shalt.err (!%p984_p9)
}
  0x37   :  { %92 = dma.hbm_to_vmem [thread:$0]  %s1423_s8, 16, %s90_s15, [#allocation12]  }
  0x38   :  { %s1137_s3 = smov [#allocation2]   ;;  %s1138_s25 = smov [#allocation7]  }
  0x39   :  { %s31_s30 = sshll.u32 %s1137_s3, 4  ;;  %s59_s26 = sshll.u32 %s1138_s25, 4  ;;  %s32_s30 = int_to_ptr.vmem [resolvable:$true] %s31_s30  ;;  %s60_s26 = int_to_ptr.vmem [resolvable:$true] %s59_s26 }
  0x3a   :  { %s988_s16 = scalar_lea.hbm %s1415_s0, 128 }
  0x3b   :  { %p989_p10 = scmp.ne.s32.totalorder %s1415_s0, %s988_s16  ;;  %p992_p11 = scmp.lt.u32.totalorder %s988_s16, %s1415_s0 }
  0x3d   :  { %p994_p12 = pnand %p992_p11, %p989_p10 }
  0x3f   :  { %997 = shalt.err (!%p994_p12)
}
  0x40   :  { %s998_s8 = scalar_lea.vmem %s32_s30, 128  ;;  %p1003_p0 = scmp.lt.s32.totalorder %s32_s30, %s32_s30 }
  0x41   :  { %p999_p13 = scmp.ne.s32.totalorder %s32_s30, %s998_s8  ;;  %p1004_p1 = scmp.lt.s32.totalorder %s998_s8, %s998_s8 }
  0x43   :  { %p1005_p2 = por %p1004_p1, %p1003_p0 }
  0x45   :  { %p1006_p3 = pnand %p1005_p2, %p999_p13 }
  0x47   :  { %1009 = shalt.err (!%p1006_p3)
}
  0x48   :  { %34 = dma.hbm_to_vmem [thread:$0]  %s1415_s0, 128, %s32_s30, [#allocation3]  }
  0x49   :  { %s1010_s28 = scalar_lea.hbm %s1420_s5, 16 }
  0x4a   :  { %p1011_p4 = scmp.ne.s32.totalorder %s1420_s5, %s1010_s28  ;;  %p1014_p5 = scmp.lt.u32.totalorder %s1010_s28, %s1420_s5 }
  0x4c   :  { %p1016_p6 = pnand %p1014_p5, %p1011_p4 }
  0x4e   :  { %1019 = shalt.err (!%p1016_p6)
}
  0x4f   :  { %s1020_s16 = scalar_lea.vmem %s60_s26, 16  ;;  %s1024_s17 = scalar_lea.vmem %s60_s26, 32 }
  0x50   :  { %p1021_p7 = scmp.ne.s32.totalorder %s60_s26, %s1020_s16  ;;  %p1025_p8 = scmp.lt.s32.totalorder %s60_s26, %s60_s26 }
  0x51   :  { %p1026_p9 = scmp.lt.s32.totalorder %s1024_s17, %s1020_s16 }
  0x53   :  { %p1027_p10 = por %p1026_p9, %p1025_p8 }
  0x55   :  { %p1028_p11 = pnand %p1027_p10, %p1021_p7 }
  0x57   :  { %1031 = shalt.err (!%p1028_p11)
}
  0x58   :  { %62 = dma.hbm_to_vmem [thread:$0]  %s1420_s5, 16, %s60_s26, [#allocation6]  }
  0x59   :  { %s1139_s18 = smov [#allocation10]   ;;  %s1140_s20 = smov [#allocation13]  }
  0x5a   :  { %s79_s19 = sshll.u32 %s1139_s18, 4  ;;  %s99_s8 = sshll.u32 %s1140_s20, 4  ;;  %s80_s19 = int_to_ptr.vmem [resolvable:$true] %s79_s19  ;;  %s100_s8 = int_to_ptr.vmem [resolvable:$true] %s99_s8 }
  0x5b   :  { %s1032_s22 = scalar_lea.hbm %s1422_s7, 16 }
  0x5c   :  { %p1033_p12 = scmp.ne.s32.totalorder %s1422_s7, %s1032_s22  ;;  %p1036_p13 = scmp.lt.u32.totalorder %s1032_s22, %s1422_s7 }
  0x5e   :  { %p1038_p0 = pnand %p1036_p13, %p1033_p12 }
  0x60   :  { %1041 = shalt.err (!%p1038_p0)
}
  0x61   :  { %s1042_s5 = scalar_lea.vmem %s80_s19, 16  ;;  %s1046_s26 = scalar_lea.vmem %s80_s19, 32 }
  0x62   :  { %p1043_p1 = scmp.ne.s32.totalorder %s80_s19, %s1042_s5  ;;  %p1047_p2 = scmp.lt.s32.totalorder %s80_s19, %s80_s19 }
  0x63   :  { %p1048_p3 = scmp.lt.s32.totalorder %s1046_s26, %s1042_s5 }
  0x65   :  { %p1049_p4 = por %p1048_p3, %p1047_p2 }
  0x67   :  { %p1050_p5 = pnand %p1049_p4, %p1043_p1 }
  0x69   :  { %1053 = shalt.err (!%p1050_p5)
}
  0x6a   :  { %82 = dma.hbm_to_vmem [thread:$0]  %s1422_s7, 16, %s80_s19, [#allocation9]  }
  0x6b   :  { %s1054_s0 = scalar_lea.hbm %s1424_s9, 16 }
  0x6c   :  { %p1055_p6 = scmp.ne.s32.totalorder %s1424_s9, %s1054_s0  ;;  %p1058_p7 = scmp.lt.u32.totalorder %s1054_s0, %s1424_s9 }
  0x6e   :  { %p1060_p8 = pnand %p1058_p7, %p1055_p6 }
  0x70   :  { %1063 = shalt.err (!%p1060_p8)
}
  0x71   :  { %s1064_s21 = scalar_lea.vmem %s100_s8, 16  ;;  %s1068_s22 = scalar_lea.vmem %s100_s8, 32 }
  0x72   :  { %p1065_p9 = scmp.ne.s32.totalorder %s100_s8, %s1064_s21  ;;  %p1069_p10 = scmp.lt.s32.totalorder %s100_s8, %s100_s8 }
  0x73   :  { %p1070_p11 = scmp.lt.s32.totalorder %s1068_s22, %s1064_s21 }
  0x75   :  { %p1071_p12 = por %p1070_p11, %p1069_p10 }
  0x77   :  { %p1072_p13 = pnand %p1071_p12, %p1065_p9 }
  0x79   :  { %1075 = shalt.err (!%p1072_p13)
}
  0x7a   :  { %102 = dma.hbm_to_vmem [thread:$0]  %s1424_s9, 16, %s100_s8, [#allocation12]  }
  0x7b   :  { %s1141_s6 = smov [#allocation14]   ;;  %s1076_s5 = scalar_lea.hbm %s1426_s11, 16 }
  0x7c   :  { %s111_s28 = sshll.u32 %s1141_s6, 4  ;;  %p1077_p0 = scmp.ne.s32.totalorder %s1426_s11, %s1076_s5  ;;  %s112_s28 = int_to_ptr.vmem [resolvable:$true] %s111_s28 }
  0x7d   :  { %p1080_p1 = scmp.lt.u32.totalorder %s1076_s5, %s1426_s11 }
  0x7f   :  { %p1082_p2 = pnand %p1080_p1, %p1077_p0 }
  0x81   :  { %1085 = shalt.err (!%p1082_p2)
}
  0x82   :  { %s1086_s17 = scalar_lea.vmem %s112_s28, 16  ;;  %s1090_s9 = scalar_lea.vmem %s112_s28, 32 }
  0x83   :  { %p1087_p3 = scmp.ne.s32.totalorder %s112_s28, %s1086_s17  ;;  %p1091_p4 = scmp.lt.s32.totalorder %s112_s28, %s112_s28 }
  0x84   :  { %p1092_p5 = scmp.lt.s32.totalorder %s1090_s9, %s1086_s17 }
  0x86   :  { %p1093_p6 = por %p1092_p5, %p1091_p4 }
  0x88   :  { %p1094_p7 = pnand %p1093_p6, %p1087_p3 }
  0x8a   :  { %1097 = shalt.err (!%p1094_p7)
}
  0x8b   :  { %114 = dma.hbm_to_vmem [thread:$0]  %s1426_s11, 16, %s112_s28, [#allocation15]  }
  0x8c   :  { %1120 = dma.done.wait [#allocation3], 128  }
  0x8d   :  { %1121 = vsyncadd [#allocation3], 4294967168 }
  0x8e   :  { %1122 = dma.done.wait [#allocation6], 272  }
  0x8f   :  { %1123 = vsyncadd [#allocation6], 4294967024 }
  0x90   :  { %1124 = dma.done.wait [#allocation9], 32  }
  0x91   :  { %1125 = vsyncadd [#allocation9], 4294967264 }
  0x92   :  { %1126 = dma.done.wait [#allocation12], 32  }
  0x93   :  { %1127 = vsyncadd [#allocation12], 4294967264 }
  0x94   :  { %1128 = dma.done.wait [#allocation15], 16  }
  0x95   :  { %1129 = vsyncadd [#allocation15], 4294967280  ;;  %v1142_v0 = vmov 0.0|0.0   ;;  %vm1143_vm0 = vmmov 0   ;;  %v1144_v1 = vmov 0.0   ;;  %v1145_v2 = vmov 0  }
  0x96   :  { %870 = vmatprep.subr.bf16.mxu1 %v1142_v0  ;;  %831 = vmatprep.mubr.msk.f32.mxu1 %vm1143_vm0, %v1144_v1  ;;  %v159_v3 = vld [vmem:[#allocation5] sm:$0xff]  ;;  %v160_v4 = vld [vmem:[#allocation5 + $0x8] sm:$0xff]  ;;  %v155_v6 = vld [vmem:[%s1416_s1] sm:$0xff]  ;;  %vm173_vm1 = vcmask 130048   ;;  %v247_v10 = vlaneseq  ;;  %vm270_vm4 = vcmask 64512   ;;  %vm277_vm6 = vcmask 1043456  }
  0x97   :  { %906 = vset.pattern.permute.xlu0 %v1145_v2  ;;  %907 = vset.pattern.permute.xlu1 %v1145_v2  ;;  %v871_v5 = vpack.c.bf16 %v160_v4, %v159_v3  ;;  %v157_v7 = vld [vmem:[%s1416_s1 + $0x10] sm:$0xf]  ;;  %v154_v8 = vld [vmem:[#allocation2] sm:$0xff]  ;;  %v156_v9 = vld [vmem:[%s1416_s1 + $0x8] sm:$0xff]  ;;  %s1146_s1 = smov 96   ;;  %vm437_vm10 = vcmask 1041408  }
  0x98   :  { %840 = vmatprep.subr.bf16.mxu0 %v1144_v1  ;;  %844 = vmatprep.mubr.msk.bf16.mxu0 %vm1143_vm0, %v1144_v1  ;;  %v248_v11 = vand.u32 127, %v247_v10  ;;  %v786_v18 = vld [vmem:[%s1419_s4] ss:$0 sm:$0xff]  ;;  %v383_v42 = vshrl.u32 %v247_v10, 7  ;;  %vm397_vm12 = vcmask 162816   ;;  %vm401_vm14 = vcmask 158720  }
  0x99   :  { %250 = vperm.xlu0 %906, %v155_v6   ;;  %256 = vperm.xlu1 %907, %v157_v7   ;;  %v793_v44 = vld [vmem:[%s1417_s2] ss:$0 sm:$0xff]  ;;  %vm496_vm15 = vcmask 261120   ;;  %vm500_vm0 = vcmask 257024  }
  0x9a   :  { %872 = vmatpush3.bf16.msra.mxu1 %v871_v5  ;;  %v393_v43 = vsub.s32 0, %v383_v42  ;;  %v384_v45 = vadd.s32 8, %v383_v42  ;;  %vm389_vm11 = vcmp.eq.s32.totalorder %v383_v42, %v793_v44 }
  0x9c   :  { %vm390_vm13 = vcmp.eq.s32.totalorder %v384_v45, %v793_v44  ;;  %v150_v44 = vld [vmem:[%s1427_s12 + $0x8] sm:$0xff] }
  0x9d   :  { %832 = vmatmul.mubr.msk.f32.vlgmr.msra.gmra.mrb[0].mxu1 %vm173_vm1, %v154_v8  ;;  %253 = vperm.xlu0 %906, %v156_v9  }
 0x118   :  { %v251_v12 = vpop.permute.xlu0 %250  ;;  %v257_v17 = vpop.permute.xlu1 %256 }
 0x119   :  { %vm258_vm2 = vcmp.eq.s32.totalorder %v248_v11, %v251_v12  ;;  %vm260_vm5 = vcmp.eq.s32.totalorder %v248_v11, %v257_v17 }
 0x11a   :  { %v788_v13 = vsel %vm258_vm2, 1.0, %v1144_v1  ;;  %v790_v22 = vsel %vm260_vm5, 1.0, %v1144_v1 }
 0x11b   :  { %v268_v25 = vpack.c.bf16 %v790_v22, %v790_v22 }
 0x11c   :  { %v254_v14 = vpop.permute.xlu0 %253 }
 0x11d   :  { %vm259_vm3 = vcmp.eq.s32.totalorder %v248_v11, %v254_v14 }
 0x11e   :  { %v789_v15 = vsel %vm259_vm3, 1.0, %v1144_v1 }
 0x11f   :  { %v267_v16 = vpack.c.bf16 %v789_v15, %v788_v13 }
 0x121   :  { %836 = vmatprep.mubr.msk.bf16.mxu1 %vm270_vm4, %v267_v16  ;;  %v795_v16 = vld [vmem:[#allocation7] ss:$0 sm:$0xff] }
 0x170   :  { %v243_v19 = vpop.f32.mrb[0].mxu1 }
 0x171   :  { %v244_v20 = vadd.f32 %v786_v18, %v243_v19  ;;  %v833_v21 = vpop.f32.mrb[1].mxu1 }
 0x173   :  { %v269_v23 = vpack.c.bf16 %v244_v20, %v244_v20 }
 0x175   :  { %v279_v24 = vsel %vm277_vm6, %v269_v23, 0  ;;  %889 = vmatprep.subr.msk.bf16.mxu1 %vm277_vm6, %v269_v23 }
 0x176   :  { %835 = vmatpush3.bf16.msra.mxu1 %v279_v24 }
 0x179   :  { %837 = vmatmul.mubr.msk.bf16.vlgmr.msra.gmra.mrb[4].mxu1 %vm270_vm4, %v268_v25 }
 0x24c   :  { %v838_v26 = vpop.f32.mrb[4].mxu1 }
 0x24d   :  { %v315_v27 = vpop.f32.mrb[5].mxu1  ;;  %v334_v30 = vmul.f32 0.2, %v838_v26  ;;  %vm331_vm9 = vcmp.ge.f32.partialorder %v838_v26, 0.0  ;;  %v433_v35 = vpack.c.bf16 %v838_v26, %v838_v26 }
 0x24e   :  { %v332_v28 = vmul.f32 0.2, %v315_v27  ;;  %v839_v29 = vpop.f32.mrb[6].mxu1  ;;  %vm329_vm7 = vcmp.ge.f32.partialorder %v315_v27, 0.0 }
 0x24f   :  { %v318_v31 = vpop.f32.mrb[7].mxu1  ;;  %v337_v37 = vsel %vm331_vm9, %v838_v26, %v334_v30  ;;  %v439_v38 = vsel %vm437_vm10, %v433_v35, 0 }
 0x250   :  { %v333_v32 = vmul.f32 0.2, %v318_v31  ;;  %v335_v33 = vsel %vm329_vm7, %v315_v27, %v332_v28  ;;  %v432_v34 = vpack.c.bf16 %v318_v31, %v315_v27  ;;  %vm330_vm8 = vcmp.ge.f32.partialorder %v318_v31, 0.0 }
 0x251   :  { %341 = vrot.lane.b32.xlu1 %v335_v33, %s1146_s1 }
 0x252   :  { %841 = vmatpush3.bf16.msra.mxu0 %v432_v34  ;;  %v336_v36 = vsel %vm330_vm8, %v318_v31, %v333_v32 }
 0x253   :  { %343 = vrot.lane.b32.xlu0 %v336_v36, %s1146_s1  ;;  %842 = vmatprep.subr.bf16.mxu0 %v1144_v1 }
 0x255   :  { %345 = vrot.lane.b32.xlu1 %v337_v37, %s1146_s1  ;;  %v144_v37 = vld [vmem:[%s1425_s10] sm:$0xff] }
 0x256   :  { %843 = vmatpush3.bf16.msra.mxu0 %v439_v38  ;;  %v145_v38 = vld [vmem:[%s1425_s10 + $0x8] sm:$0xff] }
 0x2c3   :  { %v342_v39 = vpop.permute.xlu1 %341 }
 0x2c4   :  { %350 = vxpose.xlu0.b32.start [1/3] (short) (narrow) %v342_v39, 8  ;;  %v873_v39 = vpack.c.bf16 %v145_v38, %v144_v37  ;;  %v805_v38 = vld [vmem:[#allocation13] ss:$0 sm:$0xff] }
 0x2c5   :  { %v344_v40 = vpop.permute.xlu0 %343 }
 0x2c6   :  { %874 = vmatprep.subr.bf16.mxu1 %v873_v39 }
 0x2c7   :  { %v346_v41 = vpop.permute.xlu1 %345  ;;  %876 = vmatpush3.bf16.msra.mxu1 %v873_v39 }
 0x2c8   :  { %351 = vxpose.xlu0.b32.cont [2/3] (short) (narrow) %v344_v40, 8  ;;  %v146_v40 = vld [vmem:[%s1425_s10 + $0x10] sm:$0xff] }
 0x2cc   :  { %352 = vxpose.xlu0.b32.end [3/3] (short) (narrow) %v346_v41, 8  ;;  %v147_v41 = vld [vmem:[%s1425_s10 + $0x18] sm:$0xff] }
 0x2cd   :  { %v877_v42 = vpack.c.bf16 %v147_v41, %v146_v40 }
 0x2cf   :  { %878 = vmatprep.subr.bf16.mxu1 %v877_v42 }
 0x2d0   :  { %880 = vmatpush3.bf16.msra.mxu1 %v877_v42 }
 0x344   :  { %v366_v46 = vpop.trf.xlu0 }
 0x345   :  { %v394_v47 = vrot.slane %v366_v46, %v393_v43 }
 0x347   :  { %v395_v48 = vsel %vm389_vm11, %v394_v47, -1e+30  ;;  %v396_v50 = vsel %vm390_vm13, %v394_v47, -1e+30 }
 0x348   :  { %v398_v49 = vsel %vm397_vm12, %v395_v48, -inf  ;;  %v402_v51 = vsel %vm401_vm14, %v396_v50, -inf }
 0x349   :  { %399 = vmax.xlane.f32.xlu1 %v398_v49 }
 0x34d   :  { %403 = vmax.xlane.f32.xlu1 %v402_v51 }
 0x3d6   :  { %v400_v52 = vpop.xlane.xlu1 %399 }
 0x3d7   :  { %v405_v53 = vsel %vm389_vm11, %v400_v52, -1e+30 }
 0x3d8   :  { %v407_v56 = vsel %vm397_vm12, %v405_v53, -inf  ;;  %v796_v53 = vld [vmem:[#allocation8] ss:$0 sm:$0xff] }
 0x3da   :  { %v404_v54 = vpop.xlane.xlu1 %403 }
 0x3db   :  { %v406_v55 = vsel %vm390_vm13, %v404_v54, -1e+30 }
 0x3dc   :  { %v408_v57 = vsel %vm401_vm14, %v406_v55, -inf  ;;  %v797_v55 = vld [vmem:[#allocation10] ss:$0 sm:$0xff] }
 0x3dd   :  { %v409_v58 = vmax.f32 %v407_v56, %v408_v57 }
 0x3df   :  { %v410_v59 = vrot.slane %v409_v58, 4 }
 0x3e1   :  { %v411_v60 = vmax.f32 %v409_v58, %v410_v59 }
 0x3e3   :  { %v412_v61 = vrot.slane %v411_v60, 2 }
 0x3e5   :  { %v413_v62 = vmax.f32 %v411_v60, %v412_v61 }
 0x3e7   :  { %v414_v63 = vrot.slane %v413_v62, 1 }
 0x3e9   :  { %v415_v0 = vmax.f32 %v413_v62, %v414_v63  ;;  %v151_v62 = vld [vmem:[%s1427_s12 + $0x10] sm:$0xff]  ;;  %v152_v63 = vld [vmem:[%s1427_s12 + $0x18] sm:$0xff] }
 0x3eb   :  { %v416_v1 = vsub.f32 %v366_v46, %v415_v0  ;;  %v885_v0 = vpack.c.bf16 %v152_v63, %v151_v62 }
 0x3ed   :  { %v417_v2 = vmul.f32 1.442695, %v416_v1  ;;  %v798_v1 = vld [vmem:[#allocation14] ss:$0 sm:$0xff] }
 0x3ef   :  { %908 = vpow2.f32 %v417_v2 }
 0x3f9   :  { %v909_v3 = vpop.eup %908 }
 0x3fa   :  { %v422_v4 = vrot.slane %v909_v3, %v393_v43  ;;  %v149_v43 = vld [vmem:[%s1427_s12] sm:$0xff]  ;;  %s1147_s12 = smov [#allocation16]  }
 0x3fb   :  { %v881_v45 = vpack.c.bf16 %v150_v44, %v149_v43 }
 0x3fc   :  { %v424_v5 = vsel %vm390_vm13, %v422_v4, 0.0  ;;  %v423_v6 = vsel %vm389_vm11, %v422_v4, 0.0 }
 0x3fd   :  { %v428_v7 = vsel %vm401_vm14, %v424_v5, 0.0  ;;  %v425_v8 = vsel %vm397_vm12, %v423_v6, 0.0  ;;  %v431_v9 = vpack.c.bf16 %v424_v5, %v423_v6  ;;  %882 = vmatprep.subr.bf16.mxu0 %v881_v45 }
 0x3fe   :  { %429 = vadd.xlane.f32.xlu1 %v428_v7  ;;  %426 = vadd.xlane.f32.xlu0 %v425_v8  ;;  %v801_v8 = vld [vmem:[%s1428_s13] ss:$0 sm:$0xff]  ;;  %s770_s13 = sshll.u32 %s1147_s12, 4  ;;  %s771_s13 = int_to_ptr.vmem [resolvable:$true] %s770_s13 }
 0x3ff   :  { %845 = vmatmul.mubr.msk.bf16.vlgmr.msra.gmra.mrb[0].mxu0 %vm397_vm12, %v431_v9  ;;  %s1098_s20 = scalar_lea.vmem %s771_s13, 256  ;;  %p1103_p9 = scmp.lt.s32.totalorder %s771_s13, %s771_s13 }
 0x400   :  { %884 = vmatpush3.bf16.msra.mxu0 %v881_v45  ;;  %p1099_p8 = scmp.ne.s32.totalorder %s771_s13, %s1098_s20  ;;  %p1104_p10 = scmp.lt.s32.totalorder %s1098_s20, %s1098_s20 }
 0x401   :  { %886 = vmatprep.subr.bf16.mxu0 %v885_v0 }
 0x402   :  { %p1105_p11 = por %p1104_p10, %p1103_p9 }
 0x404   :  { %888 = vmatpush3.bf16.msra.mxu0 %v885_v0  ;;  %p1106_p12 = pnand %p1105_p11, %p1099_p8 }
 0x48b   :  { %v427_v10 = vpop.xlane.xlu0 %426  ;;  %v430_v11 = vpop.xlane.xlu1 %429 }
 0x48c   :  { %v482_v12 = vadd.f32 1e-16, %v427_v10  ;;  %v483_v13 = vadd.f32 1e-16, %v430_v11 }
 0x48e   :  { %910 = vrcp.f32 %v482_v12 }
 0x48f   :  { %912 = vrcp.f32 %v483_v13 }
 0x498   :  { %v911_v14 = vpop.eup %910 }
 0x499   :  { %v913_v19 = vpop.eup %912 }
 0x4d2   :  { %v475_v15 = vpop.f32.mrb[0].mxu0 }
 0x4d3   :  { %v486_v17 = vmul.f32 %v911_v14, %v475_v15  ;;  %v846_v18 = vpop.f32.mrb[1].mxu0 }
 0x4d4   :  { %v478_v20 = vpop.f32.mrb[2].mxu0 }
 0x4d5   :  { %v487_v21 = vmul.f32 %v913_v19, %v478_v20  ;;  %v847_v22 = vpop.f32.mrb[3].mxu0  ;;  %v494_v23 = vadd.f32 %v795_v16, %v486_v17 }
 0x4d7   :  { %v497_v24 = vsel %vm496_vm15, %v494_v23, 0.0  ;;  %v495_v25 = vadd.f32 %v795_v16, %v487_v21 }
 0x4d8   :  { %498 = vadd.xlane.f32.xlu1 %v497_v24 }
 0x4d9   :  { %v501_v26 = vsel %vm500_vm0, %v495_v25, 0.0 }
 0x4dc   :  { %502 = vadd.xlane.f32.xlu1 %v501_v26 }
 0x565   :  { %v499_v27 = vpop.xlane.xlu1 %498 }
 0x566   :  { %v505_v28 = vmul.f32 0.03125, %v499_v27 }
 0x568   :  { %v507_v29 = vsub.f32 %v494_v23, %v505_v28 }
 0x569   :  { %v503_v30 = vpop.xlane.xlu1 %502 }
 0x56a   :  { %v506_v31 = vmul.f32 0.03125, %v503_v30  ;;  %v509_v32 = vmul.f32 %v507_v29, %v507_v29 }
 0x56c   :  { %v508_v33 = vsub.f32 %v495_v25, %v506_v31  ;;  %v511_v34 = vsel %vm496_vm15, %v509_v32, 0.0 }
 0x56d   :  { %512 = vadd.xlane.f32.xlu1 %v511_v34 }
 0x56e   :  { %v510_v35 = vmul.f32 %v508_v33, %v508_v33 }
 0x570   :  { %v514_v36 = vsel %vm500_vm0, %v510_v35, 0.0 }
 0x571   :  { %515 = vadd.xlane.f32.xlu1 %v514_v36  ;;  %v804_v36 = vld [vmem:[#allocation11] ss:$0 sm:$0xff] }
 0x5fa   :  { %v513_v46 = vpop.xlane.xlu1 %512 }
 0x5fb   :  { %v517_v47 = vmul.f32 0.03125, %v513_v46 }
 0x5fd   :  { %v519_v48 = vadd.f32 1e-05, %v517_v47 }
 0x5fe   :  { %v516_v49 = vpop.xlane.xlu1 %515 }
 0x5ff   :  { %914 = vrsqrt.f32 %v519_v48  ;;  %v518_v50 = vmul.f32 0.03125, %v516_v49 }
 0x601   :  { %v520_v51 = vadd.f32 1e-05, %v518_v50 }
 0x603   :  { %916 = vrsqrt.f32 %v520_v51 }
 0x609   :  { %v915_v52 = vpop.eup %914 }
 0x60a   :  { %v523_v54 = vmul.f32 %v915_v52, %v507_v29 }
 0x60c   :  { %v531_v56 = vmul.f32 %v796_v53, %v523_v54 }
 0x60d   :  { %v917_v57 = vpop.eup %916 }
 0x60e   :  { %v524_v58 = vmul.f32 %v917_v57, %v508_v33  ;;  %v539_v59 = vadd.f32 %v797_v55, %v531_v56 }
 0x610   :  { %v532_v60 = vmul.f32 %v796_v53, %v524_v58  ;;  %856 = vmatprep.mubr.msk.f32.mxu1 %vm496_vm15, %v539_v59 }
 0x612   :  { %v540_v61 = vadd.f32 %v797_v55, %v532_v60 }
 0x614   :  { %857 = vmatmul.mubr.msk.f32.vlgmr.msra.gmra.mrb[2].mxu1 %vm496_vm15, %v540_v61 }
 0x6e7   :  { %v858_v2 = vpop.f32.mrb[2].mxu1 }
 0x6e8   :  { %v625_v3 = vadd.f32 %v858_v2, %v798_v1  ;;  %v619_v4 = vpop.f32.mrb[3].mxu1 }
 0x6e9   :  { %v620_v5 = vadd.f32 %v798_v1, %v619_v4 }
 0x6ea   :  { %v629_v7 = vmax.f32 %v625_v3, 0.0 }
 0x6eb   :  { %v628_v6 = vmax.f32 %v620_v5, 0.0 }
 0x6ed   :  { %867 = vmatprep.mubr.msk.f32.mxu0 %vm496_vm15, %v628_v6 }
 0x6ee   :  { %868 = vmatmul.mubr.msk.f32.vlgmr.msra.gmra.mrb[4].mxu0 %vm496_vm15, %v629_v7 }
 0x7c1   :  { %v869_v9 = vpop.f32.mrb[4].mxu0 }
 0x7c2   :  { %v714_v10 = vadd.f32 %v869_v9, %v801_v8  ;;  %v708_v11 = vpop.f32.mrb[5].mxu0 }
 0x7c3   :  { %v709_v12 = vadd.f32 %v801_v8, %v708_v11 }
 0x7c4   :  { %v718_v13 = vmax.f32 %v714_v10, 0.0 }
 0x7c5   :  { %v717_v14 = vmax.f32 %v709_v12, 0.0 }
 0x7c6   :  { %v720_v17 = vadd.f32 %v718_v13, %v540_v61 }
 0x7c7   :  { %v719_v15 = vadd.f32 %v717_v14, %v539_v59 }
 0x7c8   :  { %v724_v18 = vsel %vm500_vm0, %v720_v17, 0.0 }
 0x7c9   :  { %v721_v16 = vsel %vm496_vm15, %v719_v15, 0.0 }
 0x7ca   :  { %722 = vadd.xlane.f32.xlu1 %v721_v16 }
 0x7ce   :  { %725 = vadd.xlane.f32.xlu1 %v724_v18 }
 0x857   :  { %v723_v19 = vpop.xlane.xlu1 %722 }
 0x858   :  { %v727_v20 = vmul.f32 0.03125, %v723_v19 }
 0x85a   :  { %v729_v21 = vsub.f32 %v719_v15, %v727_v20 }
 0x85b   :  { %v726_v22 = vpop.xlane.xlu1 %725 }
 0x85c   :  { %v728_v23 = vmul.f32 0.03125, %v726_v22  ;;  %v731_v24 = vmul.f32 %v729_v21, %v729_v21 }
 0x85e   :  { %v730_v25 = vsub.f32 %v720_v17, %v728_v23  ;;  %v733_v26 = vsel %vm496_vm15, %v731_v24, 0.0 }
 0x85f   :  { %734 = vadd.xlane.f32.xlu1 %v733_v26 }
 0x860   :  { %v732_v27 = vmul.f32 %v730_v25, %v730_v25 }
 0x862   :  { %v736_v28 = vsel %vm500_vm0, %v732_v27, 0.0 }
 0x863   :  { %737 = vadd.xlane.f32.xlu1 %v736_v28 }
 0x8ec   :  { %v735_v29 = vpop.xlane.xlu1 %734 }
 0x8ed   :  { %v739_v30 = vmul.f32 0.03125, %v735_v29 }
 0x8ef   :  { %v741_v31 = vadd.f32 1e-05, %v739_v30 }
 0x8f0   :  { %v738_v32 = vpop.xlane.xlu1 %737 }
 0x8f1   :  { %918 = vrsqrt.f32 %v741_v31  ;;  %v740_v33 = vmul.f32 0.03125, %v738_v32 }
 0x8f3   :  { %v742_v34 = vadd.f32 1e-05, %v740_v33 }
 0x8f5   :  { %920 = vrsqrt.f32 %v742_v34 }
 0x8fb   :  { %v919_v35 = vpop.eup %918 }
 0x8fc   :  { %v745_v37 = vmul.f32 %v919_v35, %v729_v21 }
 0x8fe   :  { %v753_v39 = vmul.f32 %v804_v36, %v745_v37 }
 0x8ff   :  { %v921_v40 = vpop.eup %920 }
 0x900   :  { %v746_v41 = vmul.f32 %v921_v40, %v730_v25  ;;  %v761_v42 = vadd.f32 %v805_v38, %v753_v39 }
 0x902   :  { %v754_v43 = vmul.f32 %v804_v36, %v746_v41  ;;  %763 = vst.msk [vmem:[#allocation16] sm:$0xff] %vm496_vm15, %v761_v42 }
 0x904   :  { %v762_v44 = vadd.f32 %v805_v38, %v754_v43 }
 0x906   :  { %764 = vst.msk [vmem:[#allocation16 + $0x8] sm:$0xf] %vm500_vm0, %v762_v44 }
 0x907   :  { %1109 = shalt.err (!%p1106_p12)
}
 0x908   :  { %s1110_s22 = scalar_lea.hbm %s1429_s14, 256 }
 0x909   :  { %p1111_p13 = scmp.ne.s32.totalorder %s1429_s14, %s1110_s22  ;;  %p1114_p0 = scmp.lt.u32.totalorder %s1110_s22, %s1429_s14 }
 0x90b   :  { %p1116_p1 = pnand %p1114_p0, %p1111_p13 }
 0x90d   :  { %1119 = shalt.err (!%p1116_p1)
}
 0x90e   :  { %776 = dma.vmem_to_hbm [thread:$0]  %s771_s13, 256, %s1429_s14, [#allocation4], %s1133_s23, %s1133_s23, %s1134_s24  }
 0x90f   :  { %1130 = dma.done.wait [#allocation4], 256  }
 0x910   :  { %1131 = vsyncadd [#allocation4], 4294967040 }
 0x911   :  { %780 = vsyncpa [#allocation3], 1 }
 0x912   :  { %781 = vsyncpa [#allocation6], 1 }
 0x913   :  { %782 = vsyncpa [#allocation9], 1 }
 0x914   :  { %783 = vsyncpa [#allocation12], 1 }
 0x915   :  { %784 = vsyncpa [#allocation15], 1 }
 0x916   :  { %785 = vsyncpa [#allocation4], 1 }

</bundles_post_ra>
